<compile_context>
chip_gen: v6e
topology: v6e:2x2x1
jax: 0.10.0
libtpu: 0.0.40
codegen_flags: <defaults>
</compile_context>

<pallas_src>
import functools

import jax
import jax.numpy as jnp
from jax.experimental import pallas as pl
from jax.experimental.pallas import tpu as pltpu


# --------------------------- Pallas kernels ---------------------------------

def _conv_stats_kernel(x_ref, w_ref, b_ref, y_ref, st_ref, *,
                       taps, cin, cout, th, wo, n_tiles):
    """Direct conv over a VMEM-resident (phase-split, channels-last) image.

    x_ref : (1, Hps, Wps, Cph)  bf16  whole phase-split padded image
    w_ref : (kh*kw, Cin, Cout)  bf16  one (Cin, Cout) matrix per tap
    b_ref : (1, Cout)           f32
    y_ref : (1, Cout, TH*Wo)    f32   conv output tile (spatial on lanes)
    st_ref: (1, 1, Cout, 2)     f32   per-tile (sum, sum of squares)
    """
    t = pl.program_id(1)
    acc = jnp.zeros((th * wo, cout), jnp.float32)
    for (tap, c0, oi, oj) in taps:
        if n_tiles == 1:
            row_idx = slice(oi, oi + th)                 # fully static indexing
        else:
            row_idx = pl.ds(t * th + oi, th)             # dynamic row-tile start
        patch = x_ref[0, row_idx, oj:oj + wo, c0:c0 + cin]   # (TH, Wo, Cin)
        patch = patch.reshape(th * wo, cin)                  # collapse non-lane dims
        acc = acc + jnp.dot(patch, w_ref[tap, :, :],
                            preferred_element_type=jnp.float32)
    acc = acc + b_ref[...]                               # f32 epilogue (bias)
    acc_t = acc.T                                        # (Cout, TH*Wo) lane-dense
    y_ref[0, :, :] = acc_t
    s1 = jnp.sum(acc_t, axis=1, keepdims=True)           # (Cout, 1)
    s2 = jnp.sum(acc_t * acc_t, axis=1, keepdims=True)   # (Cout, 1)
    st_ref[0, 0, :, :] = jnp.concatenate([s1, s2], axis=1)


def _instnorm_apply_kernel(y_ref, mean_ref, rstd_ref, o_ref, *,
                           use_activation, slope):
    """(y - mean) * rstd (+ LeakyReLU) on a lane-dense (Cout, TH*Wo) tile."""
    y = y_ref[0, :, :]                                   # (Cout, THW) f32
    v = (y - mean_ref[0, :, :]) * rstd_ref[0, :, :]
    if use_activation:
        v = jnp.where(v >= 0.0, v, slope * v)
    o_ref[0, :, :] = v


# --------------------------- Pallas wrappers ---------------------------------

def _pick_row_tile(ho, wo, cout, budget_bytes=2 * 1024 * 1024):
    """Largest output row tile whose f32 block fits the budget while keeping
    the lane dim either the full extent or a multiple of 128."""
    if cout * ho * wo * 4 <= budget_bytes:
        return ho
    for t_h in range(ho - 1, 0, -1):
        if (ho % t_h == 0 and (t_h * wo) % 128 == 0
                and cout * t_h * wo * 4 <= budget_bytes):
            return t_h
    return ho


def _phase_split_nhwc(xp, s):
    """(N, C, Hp, Wp) -> (N, ceil(Hp/s), ceil(Wp/s), s*s*C), channels-last.

    After this transform every conv tap is a contiguous slice of the image,
    so the kernel never needs strided lane access for strided convolutions.
    """
    n, c, hp, wp = xp.shape
    if s == 1:
        return jnp.transpose(xp, (0, 2, 3, 1))
    hp2 = -(-hp // s) * s
    wp2 = -(-wp // s) * s
    xp = jnp.pad(xp, ((0, 0), (0, 0), (0, hp2 - hp), (0, wp2 - wp)))
    x6 = xp.reshape(n, c, hp2 // s, s, wp2 // s, s)
    x6 = jnp.transpose(x6, (0, 2, 4, 3, 5, 1))     # (N, Hps, Wps, pi, pj, C)
    return x6.reshape(n, hp2 // s, wp2 // s, s * s * c)


def _fused_conv_stats(x_ph, w_taps, bias, *, cin, k, stride, ho, wo, th):
    n, hps, wps, cph = x_ph.shape
    n_taps, _, cout = w_taps.shape
    n_tiles = ho // th
    hw_tile = th * wo

    taps = []
    for i in range(k):
        for j in range(k):
            c0 = ((i % stride) * stride + (j % stride)) * cin
            taps.append((i * k + j, c0, i // stride, j // stride))

    kernel = functools.partial(
        _conv_stats_kernel, taps=tuple(taps), cin=cin, cout=cout,
        th=th, wo=wo, n_tiles=n_tiles)

    y, stats = pl.pallas_call(
        kernel,
        out_shape=(
            jax.ShapeDtypeStruct((n, cout, ho * wo), jnp.float32),
            jax.ShapeDtypeStruct((n, n_tiles, cout, 2), jnp.float32),
        ),
        grid=(n, n_tiles),
        in_specs=[
            # Whole phase-split image stays resident in VMEM across the row
            # tiles of one batch element (index map ignores t -> no re-fetch).
            pl.BlockSpec((1, hps, wps, cph), lambda b, t: (b, 0, 0, 0)),
            pl.BlockSpec((n_taps, cin, cout), lambda b, t: (0, 0, 0)),
            pl.BlockSpec((1, cout), lambda b, t: (0, 0)),
        ],
        out_specs=[
            pl.BlockSpec((1, cout, hw_tile), lambda b, t: (b, 0, t)),
            pl.BlockSpec((1, 1, cout, 2), lambda b, t: (b, t, 0, 0)),
        ],
        compiler_params=pltpu.CompilerParams(
            dimension_semantics=("parallel", "arbitrary")),
    )(x_ph, w_taps, bias)
    return y, stats


def _instnorm_leaky(y, mean, rstd, *, hw_tile, use_activation, slope=0.2):
    n, cout, hw = y.shape
    n_tiles = hw // hw_tile
    return pl.pallas_call(
        functools.partial(_instnorm_apply_kernel,
                          use_activation=use_activation, slope=slope),
        out_shape=jax.ShapeDtypeStruct((n, cout, hw), jnp.float32),
        grid=(n, n_tiles),
        in_specs=[
            pl.BlockSpec((1, cout, hw_tile), lambda b, t: (b, 0, t)),
            pl.BlockSpec((1, cout, 1), lambda b, t: (b, 0, 0)),
            pl.BlockSpec((1, cout, 1), lambda b, t: (b, 0, 0)),
        ],
        out_specs=pl.BlockSpec((1, cout, hw_tile), lambda b, t: (b, 0, t)),
        compiler_params=pltpu.CompilerParams(
            dimension_semantics=("parallel", "parallel")),
    )(y, mean, rstd)


# ------------------------------ forward --------------------------------------

def conv_block_forward(w, b, x, *, down=True, use_activation=True,
                       kernel_size=3, stride=1, padding=0, output_padding=0,
                       eps=1e-5):
    """Forward of `convBlock`: conv (+ reflect pad) / ConvTranspose2d, then
    InstanceNorm2d(affine=False), then optional LeakyReLU(0.2).  NCHW f32."""
    n, cin_x, h, w_in = x.shape
    k = kernel_size
    xb = x.astype(jnp.bfloat16)          # bf16 MXU operands, f32 accumulation

    if down:
        cout, cin, kh, kw = w.shape
        assert (kh, kw) == (k, k) and cin == cin_x
        if padding > 0:
            assert padding <= h - 1 and padding <= w_in - 1  # reflect-pad rule
            xb = jnp.pad(xb, ((0, 0), (0, 0), (padding,) * 2, (padding,) * 2),
                         mode="reflect")
        conv_stride = stride
        w_conv = w
        hp, wp = h + 2 * padding, w_in + 2 * padding
        ho = (hp - k) // stride + 1
        wo = (wp - k) // stride + 1
    else:
        cin, cout, kh, kw = w.shape
        assert (kh, kw) == (k, k) and cin == cin_x
        # ConvTranspose2d == stride-1 conv of the zero-dilated input with the
        # flipped / transposed kernel.
        # TODO(synk): sub-pixel (output-phase) decomposition to skip the
        # all-zero taps of the dilated input (~stride^2 x fewer MACs).
        pb = k - 1 - padding
        pa = k - 1 - padding + output_padding
        assert pb >= 0 and pa >= 0
        hd, wd = (h - 1) * stride + 1, (w_in - 1) * stride + 1
        xd = jnp.zeros((n, cin, hd + pb + pa, wd + pb + pa), xb.dtype)
        xb = xd.at[:, :, pb:pb + hd:stride, pb:pb + wd:stride].set(xb)
        w_conv = jnp.transpose(w, (1, 0, 2, 3))[:, :, ::-1, ::-1]
        conv_stride = 1
        hp, wp = xb.shape[2], xb.shape[3]
        ho, wo = hp - k + 1, wp - k + 1

    x_ph = _phase_split_nhwc(xb, conv_stride)
    w_taps = jnp.transpose(w_conv, (2, 3, 1, 0)).reshape(k * k, cin, cout)
    w_taps = w_taps.astype(jnp.bfloat16)
    bias = b.reshape(1, cout).astype(jnp.float32)

    th = _pick_row_tile(ho, wo, cout)
    y, stats = _fused_conv_stats(x_ph, w_taps, bias, cin=cin, k=k,
                                 stride=conv_stride, ho=ho, wo=wo, th=th)

    # Tiny per-(n, c) combine of the per-tile partial stats (plain-JAX glue).
    cnt = float(ho * wo)
    sums = jnp.sum(stats[..., 0], axis=1)                # (N, Cout)
    sumsq = jnp.sum(stats[..., 1], axis=1)               # (N, Cout)
    mean = sums / cnt
    var = jnp.maximum(sumsq / cnt - mean * mean, 0.0)    # biased var (torch IN)
    rstd = jax.lax.rsqrt(var + eps)

    out = _instnorm_leaky(y, mean[:, :, None], rstd[:, :, None],
                          hw_tile=th * wo, use_activation=use_activation)
    return out.reshape(n, cout, ho, wo)


# --------------------------- pure-JAX reference -------------------------------

def conv_block_reference(w, b, x, *, down=True, use_activation=True,
                         kernel_size=3, stride=1, padding=0, output_padding=0,
                         eps=1e-5):
    if down:
        xp = (jnp.pad(x, ((0, 0), (0, 0), (padding,) * 2, (padding,) * 2),
                      mode="reflect") if padding > 0 else x)
        y = jax.lax.conv_general_dilated(
            xp, w, window_strides=(stride, stride), padding="VALID",
            dimension_numbers=("NCHW", "OIHW", "NCHW"),
            precision=jax.lax.Precision.HIGHEST)
    else:
        k = kernel_size
        w_eq = jnp.transpose(w, (1, 0, 2, 3))[:, :, ::-1, ::-1]
        pb = k - 1 - padding
        pa = k - 1 - padding + output_padding
        y = jax.lax.conv_general_dilated(
            x, w_eq, window_strides=(1, 1), padding=((pb, pa), (pb, pa)),
            lhs_dilation=(stride, stride),
            dimension_numbers=("NCHW", "OIHW", "NCHW"),
            precision=jax.lax.Precision.HIGHEST)
    y = y + b.reshape(1, -1, 1, 1)
    mean = jnp.mean(y, axis=(2, 3), keepdims=True)
    var = jnp.mean((y - mean) ** 2, axis=(2, 3), keepdims=True)
    out = (y - mean) * jax.lax.rsqrt(var + eps)
    if use_activation:
        out = jnp.where(out >= 0.0, out, 0.2 * out)
    return out


# ------------------------------- main -----------------------------------------

if __name__ == "__main__":
    key = jax.random.PRNGKey(0)

    def conv_params(key, cout, cin, k):
        k1, k2 = jax.random.split(key)
        bound = 1.0 / (cin * k * k) ** 0.5
        wgt = jax.random.uniform(k1, (cout, cin, k, k), jnp.float32, -bound, bound)
        bia = jax.random.uniform(k2, (cout,), jnp.float32, -bound, bound)
        return wgt, bia

    def convT_params(key, cin, cout, k):
        k1, k2 = jax.random.split(key)
        bound = 1.0 / (cout * k * k) ** 0.5
        wgt = jax.random.uniform(k1, (cin, cout, k, k), jnp.float32, -bound, bound)
        bia = jax.random.uniform(k2, (cout,), jnp.float32, -bound, bound)
        return wgt, bia

    kx, kd, ks, ku = jax.random.split(key, 4)
    x = jax.random.normal(kx, (2, 4, 16, 16), jnp.float32)          # NCHW

    # Round inputs / weights to bf16 once so the Pallas path (bf16 operands)
    # and the f32 XLA reference see identical values -> tight tolerance.
    bf = lambda a: a.astype(jnp.bfloat16).astype(jnp.float32)
    x = bf(x)

    cases = []
    # 1) down block: Conv2d(4->8, k=3, s=2, p=1, reflect) + IN + LeakyReLU(0.2)
    w1, b1 = conv_params(kd, 8, 4, 3)
    cases.append(dict(w=bf(w1), b=b1, down=True, use_activation=True,
                      kernel_size=3, stride=2, padding=1, output_padding=0,
                      out_shape=(2, 8, 8, 8)))
    # 2) down block, no activation: Conv2d(4->8, k=3, s=1, p=1, reflect) + IN
    w2, b2 = conv_params(ks, 8, 4, 3)
    cases.append(dict(w=bf(w2), b=b2, down=True, use_activation=False,
                      kernel_size=3, stride=1, padding=1, output_padding=0,
                      out_shape=(2, 8, 16, 16)))
    # 3) up block: ConvTranspose2d(4->8, k=3, s=2, p=1, op=1) + IN + LeakyReLU
    w3, b3 = convT_params(ku, 4, 8, 3)
    cases.append(dict(w=bf(w3), b=b3, down=False, use_activation=True,
                      kernel_size=3, stride=2, padding=1, output_padding=1,
                      out_shape=(2, 8, 32, 32)))

    fwd = jax.jit(conv_block_forward,
                  static_argnames=("down", "use_activation", "kernel_size",
                                   "stride", "padding", "output_padding"))

    for idx, c in enumerate(cases):
        kwargs = dict(down=c["down"], use_activation=c["use_activation"],
                      kernel_size=c["kernel_size"], stride=c["stride"],
                      padding=c["padding"], output_padding=c["output_padding"])
        out = jax.block_until_ready(fwd(c["w"], c["b"], x, **kwargs))
        ref = conv_block_reference(c["w"], c["b"], x, **kwargs)
        assert out.shape == c["out_shape"], (idx, out.shape)
        assert out.dtype == jnp.float32
        assert bool(jnp.all(jnp.isfinite(out)))
        err = float(jnp.max(jnp.abs(out - ref)))
        assert err < 2e-3, (idx, err)

    print("KERNEL_OK")
</pallas_src>

<mosaic_0001>
module attributes {stable_mosaic.version = 11 : i64} {
  func.func @_conv_stats_kernel(%arg0: i32, %arg1: i32, %arg2: memref<1x9x9x16xbf16, #tpu.memory_space<vmem>>, %arg3: memref<9x4x8xbf16, #tpu.memory_space<vmem>>, %arg4: memref<1x8xf32, #tpu.memory_space<vmem>>, %arg5: memref<1x8x64xf32, #tpu.memory_space<vmem>>, %arg6: memref<1x1x8x2xf32, #tpu.memory_space<vmem>>) attributes {dimension_semantics = [#tpu.dimension_semantics<parallel>, #tpu.dimension_semantics<arbitrary>], iteration_bounds = array<i64: 2, 1>, scalar_prefetch = 0 : i64, scratch_operands = 0 : i64, tpu.core_type = #tpu.core_type<tc>, window_params = [{transform_indices = @transform_0, window_bounds = array<i64: 1, 9, 9, 16>}, {pipeline_mode = #tpu.pipeline_mode<synchronous>, transform_indices = @transform_1, window_bounds = array<i64: 9, 4, 8>}, {pipeline_mode = #tpu.pipeline_mode<synchronous>, transform_indices = @transform_2, window_bounds = array<i64: 1, 8>}, {transform_indices = @transform_3, window_bounds = array<i64: 1, 8, 64>}, {transform_indices = @transform_4, window_bounds = array<i64: 1, 1, 8, 2>}]} {
    %cst = arith.constant 0.000000e+00 : f32
    %0 = vector.broadcast %cst : f32 to vector<64x8xf32>
    %c0 = arith.constant 0 : index
    %c0_0 = arith.constant 0 : index
    %c0_1 = arith.constant 0 : index
    %c0_2 = arith.constant 0 : index
    %1 = vector.load %arg2[%c0, %c0_0, %c0_1, %c0_2] : memref<1x9x9x16xbf16, #tpu.memory_space<vmem>>, vector<1x8x8x4xbf16>
    %2 = vector.shape_cast %1 : vector<1x8x8x4xbf16> to vector<8x8x4xbf16>
    %3 = vector.shape_cast %2 : vector<8x8x4xbf16> to vector<64x4xbf16>
    %c0_3 = arith.constant 0 : index
    %c0_4 = arith.constant 0 : index
    %c0_5 = arith.constant 0 : index
    %4 = vector.load %arg3[%c0_3, %c0_4, %c0_5] : memref<9x4x8xbf16, #tpu.memory_space<vmem>>, vector<1x4x8xbf16>
    %5 = vector.shape_cast %4 : vector<1x4x8xbf16> to vector<4x8xbf16>
    %cst_6 = arith.constant dense<0.000000e+00> : vector<64x8xf32>
    %6 = tpu.matmul %3, %5, %cst_6 {dimension_numbers = #tpu.dot_dimension_numbers<[1], [0], [0], [1], [0, 0, 1, 1], [], []>} : vector<64x4xbf16>, vector<4x8xbf16>, vector<64x8xf32> -> vector<64x8xf32>
    %7 = arith.addf %0, %6 : vector<64x8xf32>
    %c0_7 = arith.constant 0 : index
    %c0_8 = arith.constant 0 : index
    %c0_9 = arith.constant 0 : index
    %c4 = arith.constant 4 : index
    %8 = vector.load %arg2[%c0_7, %c0_8, %c0_9, %c4] : memref<1x9x9x16xbf16, #tpu.memory_space<vmem>>, vector<1x8x8x4xbf16>
    %9 = vector.shape_cast %8 : vector<1x8x8x4xbf16> to vector<8x8x4xbf16>
    %10 = vector.shape_cast %9 : vector<8x8x4xbf16> to vector<64x4xbf16>
    %c1 = arith.constant 1 : index
    %c0_10 = arith.constant 0 : index
    %c0_11 = arith.constant 0 : index
    %11 = vector.load %arg3[%c1, %c0_10, %c0_11] : memref<9x4x8xbf16, #tpu.memory_space<vmem>>, vector<1x4x8xbf16>
    %12 = vector.shape_cast %11 : vector<1x4x8xbf16> to vector<4x8xbf16>
    %cst_12 = arith.constant dense<0.000000e+00> : vector<64x8xf32>
    %13 = tpu.matmul %10, %12, %cst_12 {dimension_numbers = #tpu.dot_dimension_numbers<[1], [0], [0], [1], [0, 0, 1, 1], [], []>} : vector<64x4xbf16>, vector<4x8xbf16>, vector<64x8xf32> -> vector<64x8xf32>
    %14 = arith.addf %7, %13 : vector<64x8xf32>
    %c0_13 = arith.constant 0 : index
    %c0_14 = arith.constant 0 : index
    %c1_15 = arith.constant 1 : index
    %c0_16 = arith.constant 0 : index
    %15 = vector.load %arg2[%c0_13, %c0_14, %c1_15, %c0_16] : memref<1x9x9x16xbf16, #tpu.memory_space<vmem>>, vector<1x8x8x4xbf16>
    %16 = vector.shape_cast %15 : vector<1x8x8x4xbf16> to vector<8x8x4xbf16>
    %17 = vector.shape_cast %16 : vector<8x8x4xbf16> to vector<64x4xbf16>
    %c2 = arith.constant 2 : index
    %c0_17 = arith.constant 0 : index
    %c0_18 = arith.constant 0 : index
    %18 = vector.load %arg3[%c2, %c0_17, %c0_18] : memref<9x4x8xbf16, #tpu.memory_space<vmem>>, vector<1x4x8xbf16>
    %19 = vector.shape_cast %18 : vector<1x4x8xbf16> to vector<4x8xbf16>
    %cst_19 = arith.constant dense<0.000000e+00> : vector<64x8xf32>
    %20 = tpu.matmul %17, %19, %cst_19 {dimension_numbers = #tpu.dot_dimension_numbers<[1], [0], [0], [1], [0, 0, 1, 1], [], []>} : vector<64x4xbf16>, vector<4x8xbf16>, vector<64x8xf32> -> vector<64x8xf32>
    %21 = arith.addf %14, %20 : vector<64x8xf32>
    %c0_20 = arith.constant 0 : index
    %c0_21 = arith.constant 0 : index
    %c0_22 = arith.constant 0 : index
    %c8 = arith.constant 8 : index
    %22 = vector.load %arg2[%c0_20, %c0_21, %c0_22, %c8] : memref<1x9x9x16xbf16, #tpu.memory_space<vmem>>, vector<1x8x8x4xbf16>
    %23 = vector.shape_cast %22 : vector<1x8x8x4xbf16> to vector<8x8x4xbf16>
    %24 = vector.shape_cast %23 : vector<8x8x4xbf16> to vector<64x4xbf16>
    %c3 = arith.constant 3 : index
    %c0_23 = arith.constant 0 : index
    %c0_24 = arith.constant 0 : index
    %25 = vector.load %arg3[%c3, %c0_23, %c0_24] : memref<9x4x8xbf16, #tpu.memory_space<vmem>>, vector<1x4x8xbf16>
    %26 = vector.shape_cast %25 : vector<1x4x8xbf16> to vector<4x8xbf16>
    %cst_25 = arith.constant dense<0.000000e+00> : vector<64x8xf32>
    %27 = tpu.matmul %24, %26, %cst_25 {dimension_numbers = #tpu.dot_dimension_numbers<[1], [0], [0], [1], [0, 0, 1, 1], [], []>} : vector<64x4xbf16>, vector<4x8xbf16>, vector<64x8xf32> -> vector<64x8xf32>
    %28 = arith.addf %21, %27 : vector<64x8xf32>
    %c0_26 = arith.constant 0 : index
    %c0_27 = arith.constant 0 : index
    %c0_28 = arith.constant 0 : index
    %c12 = arith.constant 12 : index
    %29 = vector.load %arg2[%c0_26, %c0_27, %c0_28, %c12] : memref<1x9x9x16xbf16, #tpu.memory_space<vmem>>, vector<1x8x8x4xbf16>
    %30 = vector.shape_cast %29 : vector<1x8x8x4xbf16> to vector<8x8x4xbf16>
    %31 = vector.shape_cast %30 : vector<8x8x4xbf16> to vector<64x4xbf16>
    %c4_29 = arith.constant 4 : index
    %c0_30 = arith.constant 0 : index
    %c0_31 = arith.constant 0 : index
    %32 = vector.load %arg3[%c4_29, %c0_30, %c0_31] : memref<9x4x8xbf16, #tpu.memory_space<vmem>>, vector<1x4x8xbf16>
    %33 = vector.shape_cast %32 : vector<1x4x8xbf16> to vector<4x8xbf16>
    %cst_32 = arith.constant dense<0.000000e+00> : vector<64x8xf32>
    %34 = tpu.matmul %31, %33, %cst_32 {dimension_numbers = #tpu.dot_dimension_numbers<[1], [0], [0], [1], [0, 0, 1, 1], [], []>} : vector<64x4xbf16>, vector<4x8xbf16>, vector<64x8xf32> -> vector<64x8xf32>
    %35 = arith.addf %28, %34 : vector<64x8xf32>
    %c0_33 = arith.constant 0 : index
    %c0_34 = arith.constant 0 : index
    %c1_35 = arith.constant 1 : index
    %c8_36 = arith.constant 8 : index
    %36 = vector.load %arg2[%c0_33, %c0_34, %c1_35, %c8_36] : memref<1x9x9x16xbf16, #tpu.memory_space<vmem>>, vector<1x8x8x4xbf16>
    %37 = vector.shape_cast %36 : vector<1x8x8x4xbf16> to vector<8x8x4xbf16>
    %38 = vector.shape_cast %37 : vector<8x8x4xbf16> to vector<64x4xbf16>
    %c5 = arith.constant 5 : index
    %c0_37 = arith.constant 0 : index
    %c0_38 = arith.constant 0 : index
    %39 = vector.load %arg3[%c5, %c0_37, %c0_38] : memref<9x4x8xbf16, #tpu.memory_space<vmem>>, vector<1x4x8xbf16>
    %40 = vector.shape_cast %39 : vector<1x4x8xbf16> to vector<4x8xbf16>
    %cst_39 = arith.constant dense<0.000000e+00> : vector<64x8xf32>
    %41 = tpu.matmul %38, %40, %cst_39 {dimension_numbers = #tpu.dot_dimension_numbers<[1], [0], [0], [1], [0, 0, 1, 1], [], []>} : vector<64x4xbf16>, vector<4x8xbf16>, vector<64x8xf32> -> vector<64x8xf32>
    %42 = arith.addf %35, %41 : vector<64x8xf32>
    %c0_40 = arith.constant 0 : index
    %c1_41 = arith.constant 1 : index
    %c0_42 = arith.constant 0 : index
    %c0_43 = arith.constant 0 : index
    %43 = vector.load %arg2[%c0_40, %c1_41, %c0_42, %c0_43] : memref<1x9x9x16xbf16, #tpu.memory_space<vmem>>, vector<1x8x8x4xbf16>
    %44 = vector.shape_cast %43 : vector<1x8x8x4xbf16> to vector<8x8x4xbf16>
    %45 = vector.shape_cast %44 : vector<8x8x4xbf16> to vector<64x4xbf16>
    %c6 = arith.constant 6 : index
    %c0_44 = arith.constant 0 : index
    %c0_45 = arith.constant 0 : index
    %46 = vector.load %arg3[%c6, %c0_44, %c0_45] : memref<9x4x8xbf16, #tpu.memory_space<vmem>>, vector<1x4x8xbf16>
    %47 = vector.shape_cast %46 : vector<1x4x8xbf16> to vector<4x8xbf16>
    %cst_46 = arith.constant dense<0.000000e+00> : vector<64x8xf32>
    %48 = tpu.matmul %45, %47, %cst_46 {dimension_numbers = #tpu.dot_dimension_numbers<[1], [0], [0], [1], [0, 0, 1, 1], [], []>} : vector<64x4xbf16>, vector<4x8xbf16>, vector<64x8xf32> -> vector<64x8xf32>
    %49 = arith.addf %42, %48 : vector<64x8xf32>
    %c0_47 = arith.constant 0 : index
    %c1_48 = arith.constant 1 : index
    %c0_49 = arith.constant 0 : index
    %c4_50 = arith.constant 4 : index
    %50 = vector.load %arg2[%c0_47, %c1_48, %c0_49, %c4_50] : memref<1x9x9x16xbf16, #tpu.memory_space<vmem>>, vector<1x8x8x4xbf16>
    %51 = vector.shape_cast %50 : vector<1x8x8x4xbf16> to vector<8x8x4xbf16>
    %52 = vector.shape_cast %51 : vector<8x8x4xbf16> to vector<64x4xbf16>
    %c7 = arith.constant 7 : index
    %c0_51 = arith.constant 0 : index
    %c0_52 = arith.constant 0 : index
    %53 = vector.load %arg3[%c7, %c0_51, %c0_52] : memref<9x4x8xbf16, #tpu.memory_space<vmem>>, vector<1x4x8xbf16>
    %54 = vector.shape_cast %53 : vector<1x4x8xbf16> to vector<4x8xbf16>
    %cst_53 = arith.constant dense<0.000000e+00> : vector<64x8xf32>
    %55 = tpu.matmul %52, %54, %cst_53 {dimension_numbers = #tpu.dot_dimension_numbers<[1], [0], [0], [1], [0, 0, 1, 1], [], []>} : vector<64x4xbf16>, vector<4x8xbf16>, vector<64x8xf32> -> vector<64x8xf32>
    %56 = arith.addf %49, %55 : vector<64x8xf32>
    %c0_54 = arith.constant 0 : index
    %c1_55 = arith.constant 1 : index
    %c1_56 = arith.constant 1 : index
    %c0_57 = arith.constant 0 : index
    %57 = vector.load %arg2[%c0_54, %c1_55, %c1_56, %c0_57] : memref<1x9x9x16xbf16, #tpu.memory_space<vmem>>, vector<1x8x8x4xbf16>
    %58 = vector.shape_cast %57 : vector<1x8x8x4xbf16> to vector<8x8x4xbf16>
    %59 = vector.shape_cast %58 : vector<8x8x4xbf16> to vector<64x4xbf16>
    %c8_58 = arith.constant 8 : index
    %c0_59 = arith.constant 0 : index
    %c0_60 = arith.constant 0 : index
    %60 = vector.load %arg3[%c8_58, %c0_59, %c0_60] : memref<9x4x8xbf16, #tpu.memory_space<vmem>>, vector<1x4x8xbf16>
    %61 = vector.shape_cast %60 : vector<1x4x8xbf16> to vector<4x8xbf16>
    %cst_61 = arith.constant dense<0.000000e+00> : vector<64x8xf32>
    %62 = tpu.matmul %59, %61, %cst_61 {dimension_numbers = #tpu.dot_dimension_numbers<[1], [0], [0], [1], [0, 0, 1, 1], [], []>} : vector<64x4xbf16>, vector<4x8xbf16>, vector<64x8xf32> -> vector<64x8xf32>
    %63 = arith.addf %56, %62 : vector<64x8xf32>
    %c0_62 = arith.constant 0 : index
    %c0_63 = arith.constant 0 : index
    %64 = vector.load %arg4[%c0_62, %c0_63] : memref<1x8xf32, #tpu.memory_space<vmem>>, vector<1x8xf32>
    %65 = vector.broadcast %64 : vector<1x8xf32> to vector<64x8xf32>
    %66 = arith.addf %63, %65 : vector<64x8xf32>
    %67 = tpu.transpose %66, [1, 0] : vector<64x8xf32> -> vector<8x64xf32>
    %c0_64 = arith.constant 0 : index
    %c0_65 = arith.constant 0 : index
    %c0_66 = arith.constant 0 : index
    %68 = vector.load %arg5[%c0_64, %c0_65, %c0_66] : memref<1x8x64xf32, #tpu.memory_space<vmem>>, vector<1x8x64xf32>
    %69 = vector.shape_cast %68 : vector<1x8x64xf32> to vector<8x64xf32>
    %70 = vector.shape_cast %67 : vector<8x64xf32> to vector<1x8x64xf32>
    tpu.vector_store %arg5[%c0_64, %c0_65, %c0_66], %70 {strides = array<i32>} : memref<1x8x64xf32, #tpu.memory_space<vmem>>, vector<1x8x64xf32>,
    %cst_67 = arith.constant dense<0.000000e+00> : vector<8xf32>
    %71 = vector.multi_reduction <add>, %67, %cst_67 [1] : vector<8x64xf32> to vector<8xf32>
    %72 = vector.shape_cast %71 : vector<8xf32> to vector<8x1xf32>
    %73 = arith.mulf %67, %67 : vector<8x64xf32>
    %cst_68 = arith.constant dense<0.000000e+00> : vector<8xf32>
    %74 = vector.multi_reduction <add>, %73, %cst_68 [1] : vector<8x64xf32> to vector<8xf32>
    %75 = vector.shape_cast %74 : vector<8xf32> to vector<8x1xf32>
    %76 = tpu.concatenate %72, %75 in 1 : vector<8x1xf32>, vector<8x1xf32> -> vector<8x2xf32>
    %c0_69 = arith.constant 0 : index
    %c0_70 = arith.constant 0 : index
    %c0_71 = arith.constant 0 : index
    %c0_72 = arith.constant 0 : index
    %77 = vector.load %arg6[%c0_69, %c0_70, %c0_71, %c0_72] : memref<1x1x8x2xf32, #tpu.memory_space<vmem>>, vector<1x1x8x2xf32>
    %78 = vector.shape_cast %77 : vector<1x1x8x2xf32> to vector<8x2xf32>
    %79 = vector.shape_cast %76 : vector<8x2xf32> to vector<1x1x8x2xf32>
    tpu.vector_store %arg6[%c0_69, %c0_70, %c0_71, %c0_72], %79 {strides = array<i32>} : memref<1x1x8x2xf32, #tpu.memory_space<vmem>>, vector<1x1x8x2xf32>,
    return
  }
  func.func @transform_0(%arg0: i32, %arg1: i32) -> (i32, i32, i32, i32) {
    %c0_i32 = arith.constant 0 : i32
    %c0_i32_0 = arith.constant 0 : i32
    %c0_i32_1 = arith.constant 0 : i32
    %c0_i32_2 = arith.constant 0 : i32
    return %arg0, %c0_i32, %c0_i32_0, %c0_i32_1 : i32, i32, i32, i32
  }
  func.func @transform_1(%arg0: i32, %arg1: i32) -> (i32, i32, i32) {
    %c0_i32 = arith.constant 0 : i32
    %c0_i32_0 = arith.constant 0 : i32
    %c0_i32_1 = arith.constant 0 : i32
    %c0_i32_2 = arith.constant 0 : i32
    return %c0_i32, %c0_i32_0, %c0_i32_1 : i32, i32, i32
  }
  func.func @transform_2(%arg0: i32, %arg1: i32) -> (i32, i32) {
    %c0_i32 = arith.constant 0 : i32
    %c0_i32_0 = arith.constant 0 : i32
    %c0_i32_1 = arith.constant 0 : i32
    return %c0_i32, %c0_i32_0 : i32, i32
  }
  func.func @transform_3(%arg0: i32, %arg1: i32) -> (i32, i32, i32) {
    %c0_i32 = arith.constant 0 : i32
    %c0_i32_0 = arith.constant 0 : i32
    return %arg0, %c0_i32, %arg1 : i32, i32, i32
  }
  func.func @transform_4(%arg0: i32, %arg1: i32) -> (i32, i32, i32, i32) {
    %c0_i32 = arith.constant 0 : i32
    %c0_i32_0 = arith.constant 0 : i32
    %c0_i32_1 = arith.constant 0 : i32
    return %arg0, %arg1, %c0_i32, %c0_i32_0 : i32, i32, i32, i32
  }
}

module attributes {stable_mosaic.version = 11 : i64} {
  func.func @_instnorm_apply_kernel(%arg0: i32, %arg1: i32, %arg2: memref<1x8x64xf32, #tpu.memory_space<vmem>>, %arg3: memref<1x8x1xf32, #tpu.memory_space<vmem>>, %arg4: memref<1x8x1xf32, #tpu.memory_space<vmem>>, %arg5: memref<1x8x64xf32, #tpu.memory_space<vmem>>) attributes {dimension_semantics = [#tpu.dimension_semantics<parallel>, #tpu.dimension_semantics<parallel>], iteration_bounds = array<i64: 2, 1>, scalar_prefetch = 0 : i64, scratch_operands = 0 : i64, tpu.core_type = #tpu.core_type<tc>, window_params = [{transform_indices = @transform_0, window_bounds = array<i64: 1, 8, 64>}, {transform_indices = @transform_1, window_bounds = array<i64: 1, 8, 1>}, {transform_indices = @transform_2, window_bounds = array<i64: 1, 8, 1>}, {transform_indices = @transform_3, window_bounds = array<i64: 1, 8, 64>}]} {
    %c0 = arith.constant 0 : index
    %c0_0 = arith.constant 0 : index
    %c0_1 = arith.constant 0 : index
    %0 = vector.load %arg2[%c0, %c0_0, %c0_1] : memref<1x8x64xf32, #tpu.memory_space<vmem>>, vector<1x8x64xf32>
    %1 = vector.shape_cast %0 : vector<1x8x64xf32> to vector<8x64xf32>
    %c0_2 = arith.constant 0 : index
    %c0_3 = arith.constant 0 : index
    %c0_4 = arith.constant 0 : index
    %2 = vector.load %arg3[%c0_2, %c0_3, %c0_4] : memref<1x8x1xf32, #tpu.memory_space<vmem>>, vector<1x8x1xf32>
    %3 = vector.shape_cast %2 : vector<1x8x1xf32> to vector<8x1xf32>
    %4 = vector.broadcast %3 : vector<8x1xf32> to vector<8x64xf32>
    %5 = arith.subf %1, %4 : vector<8x64xf32>
    %c0_5 = arith.constant 0 : index
    %c0_6 = arith.constant 0 : index
    %c0_7 = arith.constant 0 : index
    %6 = vector.load %arg4[%c0_5, %c0_6, %c0_7] : memref<1x8x1xf32, #tpu.memory_space<vmem>>, vector<1x8x1xf32>
    %7 = vector.shape_cast %6 : vector<1x8x1xf32> to vector<8x1xf32>
    %8 = vector.broadcast %7 : vector<8x1xf32> to vector<8x64xf32>
    %9 = arith.mulf %5, %8 : vector<8x64xf32>
    %cst = arith.constant 0.000000e+00 : f32
    %10 = vector.broadcast %cst : f32 to vector<8x64xf32>
    %11 = arith.cmpf oge, %9, %10 : vector<8x64xf32>
    %cst_8 = arith.constant 2.000000e-01 : f32
    %12 = vector.broadcast %cst_8 : f32 to vector<8x64xf32>
    %13 = arith.mulf %12, %9 : vector<8x64xf32>
    %14 = arith.select %11, %9, %13 : vector<8x64xi1>, vector<8x64xf32>
    %c0_9 = arith.constant 0 : index
    %c0_10 = arith.constant 0 : index
    %c0_11 = arith.constant 0 : index
    %15 = vector.load %arg5[%c0_9, %c0_10, %c0_11] : memref<1x8x64xf32, #tpu.memory_space<vmem>>, vector<1x8x64xf32>
    %16 = vector.shape_cast %15 : vector<1x8x64xf32> to vector<8x64xf32>
    %17 = vector.shape_cast %14 : vector<8x64xf32> to vector<1x8x64xf32>
    tpu.vector_store %arg5[%c0_9, %c0_10, %c0_11], %17 {strides = array<i32>} : memref<1x8x64xf32, #tpu.memory_space<vmem>>, vector<1x8x64xf32>,
    return
  }
  func.func @transform_0(%arg0: i32, %arg1: i32) -> (i32, i32, i32) {
    %c0_i32 = arith.constant 0 : i32
    %c0_i32_0 = arith.constant 0 : i32
    return %arg0, %c0_i32, %arg1 : i32, i32, i32
  }
  func.func @transform_1(%arg0: i32, %arg1: i32) -> (i32, i32, i32) {
    %c0_i32 = arith.constant 0 : i32
    %c0_i32_0 = arith.constant 0 : i32
    %c0_i32_1 = arith.constant 0 : i32
    return %arg0, %c0_i32, %c0_i32_0 : i32, i32, i32
  }
  func.func @transform_2(%arg0: i32, %arg1: i32) -> (i32, i32, i32) {
    %c0_i32 = arith.constant 0 : i32
    %c0_i32_0 = arith.constant 0 : i32
    %c0_i32_1 = arith.constant 0 : i32
    return %arg0, %c0_i32, %c0_i32_0 : i32, i32, i32
  }
  func.func @transform_3(%arg0: i32, %arg1: i32) -> (i32, i32, i32) {
    %c0_i32 = arith.constant 0 : i32
    %c0_i32_0 = arith.constant 0 : i32
    return %arg0, %c0_i32, %arg1 : i32, i32, i32
  }
}

</mosaic_0001>

<bundles_post_ra>
// kernel: conv_block_forward.3
= control target key start
LH: loop header
LB: loop body
LE: loop exit
PB: predicated region body
PF: predicated region fallthrough
CT: control target
= control target key end

     0   :  { %s431_s12 = smov 0   ;;  %s433_s13 = smov 0   ;;  %s470_s0 = inlined_call_operand.vmem [shape: f32[2,8,64], index: 0, kind: input, shape index: {}]   ;;  %s471_s1 = inlined_call_operand.vmem [shape: f32[2,8,1], index: 1, kind: input, shape index: {}]   ;;  %s472_s2 = inlined_call_operand.vmem [shape: f32[2,8,1], index: 2, kind: input, shape index: {}]   ;;  %s473_s3 = inlined_call_operand.vmem [shape: f32[2,8,64], index: 3, kind: output, shape index: {}]  }
   0x1   :  { %s435_s14 = smov 0  }
   0x2 LB: > { %s25_s15 = sadd.s32 1, %s404_s13  ;;  %p353_p0 = scmp.ge.s32.totalorder %s408_s14, 1  ;;  %s408_s14 = sphi %s435_s14, %s13_s14   ;;  %s404_s13 = sphi %s433_s13, %s475_s13   ;;  %s400_s12 = sphi %s431_s12, %s474_s12  }
   0x3   : > { %p27_p1 = scmp.ge.s32.totalorder %s25_s15, 2  ;;  %p173_p2 = scmp.lt.s32.totalorder %s408_s14, 3 }
   0x5   : > { %s477_s15 = smov (%p27_p1, %s25_s15), 0  ;;  %p174_p3 = pnand %p353_p0, %p173_p2 }
   0x6   : > { %p209_p4 = scmp.lt.s32.totalorder (!%p174_p3), %s400_s12, 1 }
   0x7   : > { %177 = sbr.rel (%p174_p3) target bundleno = 150 (0x96), region = 32 }
   0xc   : > { %v410_v0 = vmov 0   ;;  %s479_s12 = smov (!%p209_p4, %s400_s12), 1  ;;  %vm249_vm0 = vcmask 523264  }
   0xd   : > { %385 = vset.pattern.permute.xlu0 %v410_v0  ;;  %s354_s16 = sshll.u32 %s479_s12, 3 }
   0xe   : > { %s219_s19 = scalar_lea.vmem %s471_s1, %s354_s16  ;;  %s223_s22 = scalar_lea.vmem %s472_s2, %s354_s16 }
   0xf   : > { %v232_v1 = vld [vmem:[%s219_s19] sm:$0xff]  ;;  %s215_s25 = scalar_lea.vmem %s470_s0, %s354_s16  ;;  %s230_s28 = scalar_lea.vmem %s473_s3, %s354_s16 }
  0x10   : > { %235 = vperm.xlu0 %385, %v232_v1   ;;  %v239_v2 = vld [vmem:[%s223_s22] sm:$0xff] }
  0x11   : > { %v231_v4 = vld [vmem:[%s215_s25] sm:$0xff] }
  0x14   : > { %242 = vperm.xlu0 %385, %v239_v2  }
  0x8b   : > { %v236_v3 = vpop.permute.xlu0 %235 }
  0x8c   : > { %v238_v5 = vsub.f32 %v231_v4, %v236_v3 }
  0x8f   : > { %v243_v6 = vpop.permute.xlu0 %242 }
  0x90   : > { %v245_v7 = vmul.f32 %v243_v6, %v238_v5 }
  0x92   : > { %vm246_vm1 = vcmp.ge.f32.partialorder %v245_v7, 0.0  ;;  %v247_v8 = vmul.f32 0.2, %v245_v7 }
  0x94   : > { %v248_v9 = vsel %vm246_vm1, %v245_v7, %v247_v8 }
  0x95   : > { %250 = vst.msk [vmem:[%s230_s28] sm:$0xff] %vm249_vm0, %v248_v9 }
  0x96 PF: > { %s13_s14 = sadd.s32 1, %s408_s14   ;;  %s474_s12 = smov %s404_s13 }
  0x97   : > { %p10_p5 = scmp.ge.s32.totalorder %s13_s14, 4   ;;  %s475_s13 = smov %s477_s15 }
  0x99   :  { %12 = sbr.rel (!%p10_p5) target bundleno = 2 (0x2), region = 68 }

// kernel: conv_block_forward.2
= control target key start
LH: loop header
LB: loop body
LE: loop exit
PB: predicated region body
PF: predicated region fallthrough
CT: control target
= control target key end

     0   :  { %s1914_s15 = smov 0   ;;  %s1916_s16 = smov 0   ;;  %s2266_s0 = inlined_call_operand.vmem [shape: bf16[2,9,9,16], index: 0, kind: input, shape index: {}]   ;;  %s2267_s1 = inlined_call_operand.vmem [shape: bf16[9,4,8], index: 1, kind: input, shape index: {}]   ;;  %s2268_s2 = inlined_call_operand.vmem [shape: f32[1,8], index: 2, kind: input, shape index: {}]   ;;  %s2269_s3 = inlined_call_operand.vmem [shape: f32[2,8,64], index: 3, kind: output, shape index: {0}]   ;;  %s2270_s4 = inlined_call_operand.vmem [shape: f32[2,1,8,2], index: 4, kind: output, shape index: {1}]  }
   0x1   :  { %s1918_s17 = smov 0  }
   0x2 LB: > { %s27_s18 = sadd.s32 1, %s1880_s16  ;;  %p1587_p0 = scmp.ge.s32.totalorder %s1884_s17, 1  ;;  %s1884_s17 = sphi %s1918_s17, %s15_s17   ;;  %s1880_s16 = sphi %s1916_s16, %s2274_s16   ;;  %s1876_s15 = sphi %s1914_s15, %s2273_s15  }
   0x3   : > { %p29_p1 = scmp.ge.s32.totalorder %s27_s18, 2  ;;  %p181_p2 = scmp.lt.s32.totalorder %s1884_s17, 3 }
   0x5   : > { %s2276_s18 = smov (%p29_p1, %s27_s18), 0  ;;  %p182_p3 = pnand %p1587_p0, %p181_p2 }
   0x6   : > { %p216_p4 = scmp.lt.s32.totalorder (!%p182_p3), %s1876_s15, 1  ;;  %s1886_s29 = smov (!%p182_p3), 124  }
   0x7   : > { %185 = sbr.rel (%p182_p3) target bundleno = 663 (0x297), region = 32  ;;  %s1887_s30 = smov (!%p182_p3), 120  }
   0x8   : > { %s1888_s5 = smov (!%p182_p3), 116  }
   0xc   : > { %v1591_v0 = vld [vmem:[%s2267_s1 + $0x2] sm:$0x3]  ;;  %vm288_vm0 = vcmask 1041408   ;;  %s2278_s15 = smov (!%p216_p4, %s1876_s15), 1  ;;  %v1943_v2 = vld [vmem:[%s2267_s1] sm:$0x3] }
   0xd   : > { %1816 = vmatprep.subr.msk.bf16.mxu1 %vm288_vm0, %v1591_v0  ;;  %1815 = vmatprep.subr.msk.bf16.mxu0 %vm288_vm0, %v1591_v0  ;;  %v290_v1 = vsel %vm288_vm0, %v1591_v0, 0  ;;  %v1948_v3 = vld [vmem:[%s2267_s1 + $0x4] sm:$0x3]  ;;  %s1825_s25 = smul.u32 72, %s2278_s15  ;;  %vm453_vm1 = vsmask.f32 3328 }
   0xe   : > { %1814 = vmatpush3.bf16.msra.mxu1 %v290_v1  ;;  %1724 = vmatpush3.bf16.msra.mxu0 %v290_v1  ;;  %vm454_vm2 = vsmask.f32 7440  ;;  %vm275_vm4 = vcmask 31744   ;;  %v1613_v43 = vld [vmem:[%s2267_s1 + $0x6] sm:$0x3]  ;;  %s1589_s24 = sshll.u32 %s2278_s15, 3 }
   0xf   : > { %1817 = vmatprep.subr.msk.bf16.mxu1 %vm288_vm0, %v1943_v2  ;;  %1818 = vmatprep.subr.msk.bf16.mxu0 %vm288_vm0, %v1948_v3  ;;  %s1958_s28 = scalar_lea.vmem %s2266_s0, %s1825_s25  ;;  %vm1997_vm3 = vmor %vm453_vm1, %vm454_vm2  ;;  %s227_s27 = scalar_lea.vmem %s2269_s3, %s1589_s24  ;;  %vm1458_vm5 = vcmask 523264   ;;  %vm1467_vm6 = vcmask 7168   ;;  %vm1469_vm7 = vcmask 15360  }
  0x10   : > { %v1961_v4 = vld [vmem:[%s1958_s28 + $0x20] ss:$8 sps:$4 sm:$0xff]   ;;  %v1969_v6 = vld [vmem:[%s1958_s28 + $0x30] ss:$8 sps:$4 sm:$0xff]   ;;  %v438_v9 = vld [vmem:[%s1958_s28 + $0x4] sm:$0x1] }
  0x11   : > { %v1964_v5 = vld [vmem:[%s1958_s28] ss:$8 sps:$4 sm:$0xff]   ;;  %271 = vrot.lane.b32.xlu0 %v1961_v4, %s1886_s29  ;;  %v1974_v7 = vld [vmem:[%s1958_s28 + $0x10] ss:$8 sps:$4 sm:$0xff]   ;;  %v440_v11 = vld [vmem:[%s1958_s28 + $0xc] sm:$0x1] }
  0x12   : > { %267 = vrot.lane.b32.xlu1 %v1964_v5, %s1886_s29  ;;  %v437_v8 = vld [vmem:[%s1958_s28] sm:$0xf]  ;;  %v439_v10 = vld [vmem:[%s1958_s28 + $0x8] sm:$0xf]  ;;  %v441_v16 = vld [vmem:[%s1958_s28 + $0x10] sm:$0xf] }
  0x13   : > { %v457_v12 = vshrl.u32 %v437_v8, 16  ;;  %v460_v13 = vshll.u32 %v437_v8, 16  ;;  %v471_v14 = vshrl.u32 %v439_v10, 16  ;;  %v474_v15 = vshll.u32 %v439_v10, 16  ;;  %v442_v17 = vld [vmem:[%s1958_s28 + $0x14] sm:$0x1] }
  0x14   : > { %v466_v20 = vshll.u32 %v438_v9, 16  ;;  %v443_v22 = vld [vmem:[%s1958_s28 + $0x18] sm:$0xf]  ;;  %v480_v24 = vshll.u32 %v440_v11, 16  ;;  %v444_v25 = vld [vmem:[%s1958_s28 + $0x1c] sm:$0x1] }
  0x15   : > { %273 = vrot.lane.b32.xlu0 %v1969_v6, %s1886_s29  ;;  %v459_v18 = vrot.slane %v457_v12, 4  ;;  %v462_v19 = vrot.slane %v460_v13, 5  ;;  %v473_v21 = vrot.slane %v471_v14, 4  ;;  %v476_v23 = vrot.slane %v474_v15, 5  ;;  %v445_v32 = vld [vmem:[%s1958_s28 + $0x20] sm:$0xf] }
  0x16   : > { %269 = vrot.lane.b32.xlu1 %v1974_v7, %s1886_s29  ;;  %v485_v26 = vshrl.u32 %v441_v16, 16  ;;  %v488_v27 = vshll.u32 %v441_v16, 16  ;;  %v494_v29 = vshll.u32 %v442_v17, 16  ;;  %v499_v30 = vshrl.u32 %v443_v22, 16  ;;  %v446_v37 = vld [vmem:[%s1958_s28 + $0x24] sm:$0x1] }
  0x17   : > { %v463_v28 = vor.u32 %v462_v19, %v459_v18  ;;  %v502_v31 = vshll.u32 %v443_v22, 16  ;;  %v477_v33 = vor.u32 %v476_v23, %v473_v21  ;;  %v508_v36 = vshll.u32 %v444_v25, 16  ;;  %v447_v42 = vld [vmem:[%s1958_s28 + $0x28] sm:$0xf]  ;;  %v448_v50 = vld [vmem:[%s1958_s28 + $0x2c] sm:$0x1] }
  0x18   : > { %v487_v34 = vrot.slane %v485_v26, 4  ;;  %v490_v35 = vrot.slane %v488_v27, 5  ;;  %v468_v39 = vrot.slane %v466_v20, 5  ;;  %v501_v40 = vrot.slane %v499_v30, 4  ;;  %v449_v57 = vld [vmem:[%s1958_s28 + $0x30] sm:$0xf] }
  0x19   : > { %672 = vrot.lane.b32.xlu0 %v1964_v5, %s1887_s30  ;;  %v464_v38 = vrot.slane %v463_v28, 4  ;;  %v504_v41 = vrot.slane %v502_v31, 5  ;;  %v482_v44 = vrot.slane %v480_v24, 5  ;;  %v496_v46 = vrot.slane %v494_v29, 5  ;;  %v450_v61 = vld [vmem:[%s1958_s28 + $0x34] sm:$0x1] }
  0x1a   : > { %674 = vrot.lane.b32.xlu1 %v1974_v7, %s1887_s30  ;;  %v491_v45 = vor.u32 %v490_v35, %v487_v34  ;;  %v513_v47 = vshrl.u32 %v445_v32, 16  ;;  %v478_v48 = vrot.slane %v477_v33, 4  ;;  %v516_v51 = vshll.u32 %v445_v32, 16  ;;  %v451_v62 = vld [vmem:[%s1958_s28 + $0x38] sm:$0xf] }
  0x1b   : > { %v505_v49 = vor.u32 %v504_v41, %v501_v40  ;;  %v522_v52 = vshll.u32 %v446_v37, 16  ;;  %v510_v54 = vrot.slane %v508_v36, 5  ;;  %v527_v56 = vshrl.u32 %v447_v42, 16  ;;  %v452_v11 = vld [vmem:[%s1958_s28 + $0x3c] sm:$0x1] }
  0x1c   : > { %v492_v53 = vrot.slane %v491_v45, 4  ;;  %v515_v55 = vrot.slane %v513_v47, 4  ;;  %v469_v58 = vsel %vm1997_vm3, %v464_v38, %v468_v39  ;;  %v518_v60 = vrot.slane %v516_v51, 5  ;;  %v2054_v45 = vld [vmem:[%s1958_s28 + $0x18] ss:$8 sps:$4 sm:$0xff]  }
  0x1d   : > { %770 = vrot.lane.b32.xlu0 %v1964_v5, %s1888_s5  ;;  %v506_v59 = vrot.slane %v505_v49, 4  ;;  %v524_v63 = vrot.slane %v522_v52, 5  ;;  %v529_v0 = vrot.slane %v527_v56, 4  ;;  %v530_v1 = vshll.u32 %v447_v42, 16  ;;  %v2064_v47 = vld [vmem:[%s1958_s28 + $0x38] ss:$8 sps:$4 sm:$0xff]  }
  0x1e   : > { %772 = vrot.lane.b32.xlu1 %v1974_v7, %s1888_s5  ;;  %v536_v8 = vshll.u32 %v448_v50, 16  ;;  %v483_v9 = vsel %vm1997_vm3, %v478_v48, %v482_v44  ;;  %v519_v10 = vor.u32 %v518_v60, %v515_v55  ;;  %v541_v12 = vshrl.u32 %v449_v57, 16  ;;  %v2049_v44 = vld [vmem:[%s1958_s28 + $0x8] ss:$8 sps:$4 sm:$0xff]  }
  0x1f   : > { %v544_v13 = vshll.u32 %v449_v57, 16  ;;  %v497_v14 = vsel %vm1997_vm3, %v492_v53, %v496_v46  ;;  %v511_v15 = vsel %vm1997_vm3, %v506_v59, %v510_v54  ;;  %v532_v16 = vrot.slane %v530_v1, 5  ;;  %v2059_v46 = vld [vmem:[%s1958_s28 + $0x28] ss:$8 sps:$4 sm:$0xff]   ;;  %v1654_v54 = vld [vmem:[%s1958_s28 + $0x18] sm:$0xf] }
  0x20   : > { %v550_v17 = vshll.u32 %v450_v61, 16  ;;  %v520_v18 = vrot.slane %v519_v10, 4  ;;  %v543_v19 = vrot.slane %v541_v12, 4  ;;  %v555_v21 = vshrl.u32 %v451_v62, 16  ;;  %v1650_v48 = vld [vmem:[%s1958_s28 + $0x8] sm:$0xf] }
  0x21   : > { %676 = vrot.lane.b32.xlu0 %v1961_v4, %s1887_s30  ;;  %v546_v20 = vrot.slane %v544_v13, 5  ;;  %v533_v22 = vor.u32 %v532_v16, %v529_v0  ;;  %v538_v23 = vrot.slane %v536_v8, 5  ;;  %v558_v24 = vshll.u32 %v451_v62, 16  ;;  %v1652_v49 = vld [vmem:[%s1958_s28 + $0x10] sm:$0xf] }
  0x22   : > { %678 = vrot.lane.b32.xlu1 %v1969_v6, %s1887_s30  ;;  %v564_v25 = vshll.u32 %v452_v11, 16  ;;  %v557_v27 = vrot.slane %v555_v21, 4  ;;  %v2024_v28 = vcombine.low %v469_v58, %v483_v9  ;;  %v552_v30 = vrot.slane %v550_v17, 5  ;;  %v1656_v61 = vld [vmem:[%s1958_s28 + $0x20] sm:$0xf] }
  0x23   : > { %v547_v26 = vor.u32 %v546_v20, %v543_v19  ;;  %v534_v29 = vrot.slane %v533_v22, 4  ;;  %v560_v31 = vrot.slane %v558_v24, 5  ;;  %v2028_v32 = vcombine.low %v497_v14, %v511_v15  ;;  %v1651_v62 = vld [vmem:[%s1958_s28 + $0xc] sm:$0x1]  ;;  %v1655_v12 = vld [vmem:[%s1958_s28 + $0x1c] sm:$0x1] }
  0x24   : > { %v525_v33 = vsel %vm1997_vm3, %v520_v18, %v524_v63  ;;  %v566_v37 = vrot.slane %v564_v25, 5  ;;  %v1198_v50 = vshrl.u32 %v1650_v48, 16  ;;  %v1201_v51 = vshll.u32 %v1650_v48, 16  ;;  %v1653_v63 = vld [vmem:[%s1958_s28 + $0x14] sm:$0x1] }
  0x25   : > { %774 = vrot.lane.b32.xlu0 %v1961_v4, %s1888_s5  ;;  %v548_v34 = vrot.slane %v547_v26, 4  ;;  %v539_v35 = vsel %vm1997_vm3, %v534_v29, %v538_v23  ;;  %v561_v36 = vor.u32 %v560_v31, %v557_v27  ;;  %v1212_v52 = vshrl.u32 %v1652_v49, 16  ;;  %v1657_v13 = vld [vmem:[%s1958_s28 + $0x24] sm:$0x1] }
  0x26   : > { %776 = vrot.lane.b32.xlu1 %v1969_v6, %s1888_s5  ;;  %v2036_v38 = vcombine.low %v525_v33, %v539_v35  ;;  %v1215_v53 = vshll.u32 %v1652_v49, 16  ;;  %v1226_v55 = vshrl.u32 %v1654_v54, 16  ;;  %v1229_v56 = vshll.u32 %v1654_v54, 16  ;;  %v1660_v35 = vld [vmem:[%s1958_s28 + $0x30] sm:$0xf] }
  0x27   : > { %v553_v39 = vsel %vm1997_vm3, %v548_v34, %v552_v30  ;;  %v562_v40 = vrot.slane %v561_v36, 4  ;;  %v1200_v57 = vrot.slane %v1198_v50, 4  ;;  %v1203_v58 = vrot.slane %v1201_v51, 5  ;;  %v1658_v34 = vld [vmem:[%s1958_s28 + $0x28] sm:$0xf] }
  0x28   : > { %v1214_v59 = vrot.slane %v1212_v52, 4  ;;  %v1217_v60 = vrot.slane %v1215_v53, 5  ;;  %v1228_v0 = vrot.slane %v1226_v55, 4  ;;  %v1231_v1 = vrot.slane %v1229_v56, 5  ;;  %v1664_v50 = vld [vmem:[%s1958_s28 + $0x40] sm:$0xf] }
  0x29   : > { %868 = vrot.lane.b32.xlu0 %v2024_v28, %s1887_s30  ;;  %v567_v41 = vsel %vm1997_vm3, %v562_v40, %v566_v37  ;;  %v1204_v8 = vor.u32 %v1203_v58, %v1200_v57  ;;  %v1207_v9 = vshll.u32 %v1651_v62, 16  ;;  %v1221_v11 = vshll.u32 %v1653_v63, 16  ;;  %v1659_v58 = vld [vmem:[%s1958_s28 + $0x2c] sm:$0x1] }
  0x2a   : > { %870 = vrot.lane.b32.xlu1 %v2028_v32, %s1887_s30  ;;  %v2044_v42 = vcombine.low %v553_v39, %v567_v41  ;;  %v1218_v10 = vor.u32 %v1217_v60, %v1214_v59  ;;  %v1232_v14 = vor.u32 %v1231_v1, %v1228_v0  ;;  %v1235_v15 = vshll.u32 %v1655_v12, 16  ;;  %v1662_v41 = vld [vmem:[%s1958_s28 + $0x38] sm:$0xf]  ;;  %v1661_v59 = vld [vmem:[%s1958_s28 + $0x34] sm:$0x1] }
  0x2b   : > { %v1240_v16 = vshrl.u32 %v1656_v61, 16  ;;  %v1243_v17 = vshll.u32 %v1656_v61, 16  ;;  %v1205_v18 = vrot.slane %v1204_v8, 4  ;;  %v1209_v19 = vrot.slane %v1207_v9, 5  ;;  %v1663_v8 = vld [vmem:[%s1958_s28 + $0x3c] sm:$0x1] }
  0x2c   : > { %v1219_v20 = vrot.slane %v1218_v10, 4  ;;  %v1223_v21 = vrot.slane %v1221_v11, 5  ;;  %v1233_v22 = vrot.slane %v1232_v14, 4  ;;  %v1237_v23 = vrot.slane %v1235_v15, 5  ;;  %v1665_v9 = vld [vmem:[%s1958_s28 + $0x44] sm:$0x1] }
  0x2d   : > { %872 = vrot.lane.b32.xlu0 %v2036_v38, %s1887_s30  ;;  %v1242_v24 = vrot.slane %v1240_v16, 4  ;;  %v1245_v25 = vrot.slane %v1243_v17, 5  ;;  %v1210_v26 = vsel %vm1997_vm3, %v1205_v18, %v1209_v19  ;;  %v1249_v29 = vshll.u32 %v1657_v13, 16 }
  0x2e   : > { %874 = vrot.lane.b32.xlu1 %v2044_v42, %s1887_s30  ;;  %v1224_v27 = vsel %vm1997_vm3, %v1219_v20, %v1223_v21  ;;  %v1238_v31 = vsel %vm1997_vm3, %v1233_v22, %v1237_v23  ;;  %v1254_v37 = vshrl.u32 %v1658_v34, 16  ;;  %v1257_v39 = vshll.u32 %v1658_v34, 16  ;;  %s234_s30 = scalar_lea.vmem %s2270_s4, %s1589_s24 }
  0x2f   : > { %v2082_v30 = vcombine.low %v1210_v26, %v1224_v27  ;;  %v1246_v33 = vor.u32 %v1245_v25, %v1242_v24  ;;  %v1251_v36 = vrot.slane %v1249_v29, 5  ;;  %v1268_v40 = vshrl.u32 %v1660_v35, 16 }
  0x30   : > { %v1271_v49 = vshll.u32 %v1660_v35, 16  ;;  %v1282_v51 = vshrl.u32 %v1662_v41, 16  ;;  %v1285_v52 = vshll.u32 %v1662_v41, 16  ;;  %v1256_v53 = vrot.slane %v1254_v37, 4 }
  0x31   : > { %1085 = vrot.lane.b32.xlu0 %v2049_v44, %s1886_s29  ;;  %v1247_v48 = vrot.slane %v1246_v33, 4  ;;  %v1259_v54 = vrot.slane %v1257_v39, 5  ;;  %v1270_v55 = vrot.slane %v1268_v40, 4  ;;  %v1296_v56 = vshrl.u32 %v1664_v50, 16 }
  0x32   : > { %1087 = vrot.lane.b32.xlu1 %v2054_v45, %s1886_s29  ;;  %v1273_v60 = vrot.slane %v1271_v49, 5  ;;  %v1284_v61 = vrot.slane %v1282_v51, 4  ;;  %v1263_v0 = vshll.u32 %v1659_v58, 16  ;;  %v1277_v1 = vshll.u32 %v1661_v59, 16  ;;  %v1618_v49 = vld [vmem:[%s2267_s1 + $0x8] sm:$0x3] }
  0x33   : > { %v1252_v57 = vsel %vm1997_vm3, %v1247_v48, %v1251_v36  ;;  %v1260_v63 = vor.u32 %v1259_v54, %v1256_v53  ;;  %v1287_v11 = vrot.slane %v1285_v52, 5  ;;  %v1291_v12 = vshll.u32 %v1663_v8, 16  ;;  %v1623_v51 = vld [vmem:[%s2267_s1 + $0xa] sm:$0x3] }
  0x34   : > { %v2094_v62 = vcombine.low %v1238_v31, %v1252_v57  ;;  %v1274_v10 = vor.u32 %v1273_v60, %v1270_v55  ;;  %v1298_v13 = vrot.slane %v1296_v56, 4  ;;  %v1265_v15 = vrot.slane %v1263_v0, 5 }
  0x35   : > { %1089 = vrot.lane.b32.xlu0 %v2059_v46, %s1886_s29  ;;  %v1261_v14 = vrot.slane %v1260_v63, 4  ;;  %v1279_v16 = vrot.slane %v1277_v1, 5  ;;  %v1299_v17 = vshll.u32 %v1664_v50, 16  ;;  %v1288_v19 = vor.u32 %v1287_v11, %v1284_v61 }
  0x36   : > { %1091 = vrot.lane.b32.xlu1 %v2064_v47, %s1886_s29  ;;  %v1275_v18 = vrot.slane %v1274_v10, 4  ;;  %v1293_v20 = vrot.slane %v1291_v12, 5  ;;  %v1305_v21 = vshll.u32 %v1665_v9, 16  ;;  %v370_v39 = vsel %vm288_vm0, %v1943_v2, 0 }
  0x37   : > { %v1266_v22 = vsel %vm1997_vm3, %v1261_v14, %v1265_v15  ;;  %v1301_v23 = vrot.slane %v1299_v17, 5  ;;  %v1289_v25 = vrot.slane %v1288_v19, 4  ;;  %v595_v41 = vsel %vm288_vm0, %v1948_v3, 0 }
  0x38   : > { %v1280_v24 = vsel %vm1997_vm3, %v1275_v18, %v1279_v16  ;;  %v1307_v29 = vrot.slane %v1305_v21, 5  ;;  %v693_v2 = vsel %vm288_vm0, %v1613_v43, 0  ;;  %v791_v50 = vsel %vm288_vm0, %v1618_v49, 0 }
  0x39   : > { %v2102_v26 = vcombine.low %v1266_v22, %v1280_v24  ;;  %v1302_v27 = vor.u32 %v1301_v23, %v1298_v13  ;;  %v1294_v31 = vsel %vm1997_vm3, %v1289_v25, %v1293_v20 }
  0x3b   : > { %v1303_v33 = vrot.slane %v1302_v27, 4 }
  0x3d   : > { %v1308_v34 = vsel %vm1997_vm3, %v1303_v33, %v1307_v29 }
  0x3e   : > { %v2108_v35 = vcombine.low %v1294_v31, %v1308_v34 }
  0x83   : > { %v272_v36 = vpop.permute.xlu0 %271 }
  0x84   : > { %v268_v37 = vpop.permute.xlu1 %267  ;;  %1729 = vmatprep.mubr.msk.bf16.mxu1 %vm275_vm4, %v272_v36 }
  0x85   : > { %1725 = vmatprep.mubr.msk.bf16.mxu0 %vm275_vm4, %v268_v37 }
  0x87   : > { %v274_v40 = vpop.permute.xlu0 %273 }
  0x88   : > { %v270_v48 = vpop.permute.xlu1 %269  ;;  %1730 = vmatmul.mubr.msk.bf16.vlgmr.msra.gmra.mxu1 %vm275_vm4, %v274_v40 }
  0x89   : > { %1726 = vmatmul.mubr.msk.bf16.vlgmr.msra.gmra.mxu0 %vm275_vm4, %v270_v48  ;;  %1734 = vmatpush3.bf16.msra.mxu1 %v370_v39 }
  0x8a   : > { %1744 = vmatpush3.bf16.msra.mxu0 %v595_v41  ;;  %1735 = vmatprep.mubr.msk.bf16.mxu1 %vm275_vm4, %v1964_v5  ;;  %v1636_v5 = vld [vmem:[%s2267_s1 + $0xc] sm:$0x3] }
  0x8b   : > { %1745 = vmatprep.mubr.msk.bf16.mxu0 %vm275_vm4, %v2024_v28  ;;  %1819 = vmatprep.subr.msk.bf16.mxu1 %vm288_vm0, %v1613_v43  ;;  %v673_v3 = vpop.permute.xlu0 %672  ;;  %v1008_v52 = vsel %vm288_vm0, %v1636_v5, 0 }
  0x8c   : > { %1820 = vmatprep.subr.msk.bf16.mxu0 %vm288_vm0, %v1618_v49 }
  0x8f   : > { %v771_v28 = vpop.permute.xlu0 %770 }
  0x90   : > { %1736 = vmatmul.mubr.msk.bf16.vlgmr.msra.gmra.mxu1 %vm275_vm4, %v1974_v7  ;;  %v675_v7 = vpop.permute.xlu1 %674 }
  0x91   : > { %1746 = vmatmul.mubr.msk.bf16.vlgmr.msra.gmra.mxu0 %vm275_vm4, %v2028_v32  ;;  %1754 = vmatpush3.bf16.msra.mxu1 %v693_v2 }
  0x92   : > { %1764 = vmatpush3.bf16.msra.mxu0 %v791_v50  ;;  %1739 = vmatprep.mubr.msk.bf16.mxu1 %vm275_vm4, %v1961_v4 }
  0x93   : > { %1749 = vmatprep.mubr.msk.bf16.mxu0 %vm275_vm4, %v2036_v38  ;;  %1821 = vmatprep.subr.msk.bf16.mxu1 %vm288_vm0, %v1623_v51  ;;  %v677_v32 = vpop.permute.xlu0 %676  ;;  %v889_v38 = vsel %vm288_vm0, %v1623_v51, 0 }
  0x94   : > { %1822 = vmatprep.subr.msk.bf16.mxu0 %vm288_vm0, %v1636_v5  ;;  %v773_v4 = vpop.permute.xlu1 %772 }
  0x97   : > { %v775_v54 = vpop.permute.xlu0 %774 }
  0x98   : > { %1740 = vmatmul.mubr.msk.bf16.gmra.mxu1 %vm275_vm4, %v1969_v6  ;;  %v679_v53 = vpop.permute.xlu1 %678  ;;  %v1645_v6 = vld [vmem:[%s2267_s1 + $0xe] sm:$0x3] }
  0x99   : > { %1750 = vmatmul.mubr.msk.bf16.gmra.mxu0 %vm275_vm4, %v2044_v42  ;;  %1755 = vmatprep.mubr.msk.bf16.mxu1 %vm275_vm4, %v673_v3  ;;  %v1666_v42 = vld [vmem:[%s2267_s1 + $0x10] sm:$0x3]  ;;  %v1106_v58 = vsel %vm288_vm0, %v1645_v6, 0 }
  0x9a   : > { %1765 = vmatprep.mubr.msk.bf16.mxu0 %vm275_vm4, %v771_v28  ;;  %v1336_v59 = vsel %vm288_vm0, %v1666_v42, 0 }
  0x9b   : > { %v869_v56 = vpop.permute.xlu0 %868 }
  0x9c   : > { %v777_v55 = vpop.permute.xlu1 %776 }
  0x9f   : > { %v873_v60 = vpop.permute.xlu0 %872 }
  0xa0   : > { %1756 = vmatmul.mubr.msk.bf16.vlgmr.msra.gmra.mxu1 %vm275_vm4, %v675_v7  ;;  %v871_v57 = vpop.permute.xlu1 %870 }
  0xa1   : > { %1766 = vmatmul.mubr.msk.bf16.vlgmr.msra.gmra.mxu0 %vm275_vm4, %v773_v4  ;;  %1774 = vmatpush3.bf16.msra.mxu1 %v889_v38 }
  0xa2   : > { %1784 = vmatpush3.bf16.msra.mxu0 %v1008_v52  ;;  %1759 = vmatprep.mubr.msk.bf16.mxu1 %vm275_vm4, %v677_v32 }
  0xa3   : > { %1769 = vmatprep.mubr.msk.bf16.mxu0 %vm275_vm4, %v775_v54  ;;  %1823 = vmatprep.subr.msk.bf16.mxu1 %vm288_vm0, %v1645_v6 }
  0xa4   : > { %1824 = vmatprep.subr.msk.bf16.mxu0 %vm288_vm0, %v1666_v42  ;;  %v875_v61 = vpop.permute.xlu1 %874 }
  0xa8   : > { %1760 = vmatmul.mubr.msk.bf16.gmra.mxu1 %vm275_vm4, %v679_v53 }
  0xa9   : > { %1770 = vmatmul.mubr.msk.bf16.gmra.mxu0 %vm275_vm4, %v777_v55  ;;  %1775 = vmatprep.mubr.msk.bf16.mxu1 %vm275_vm4, %v869_v56 }
  0xaa   : > { %1785 = vmatprep.mubr.msk.bf16.mxu0 %vm275_vm4, %v2049_v44  ;;  %v1086_v44 = vpop.permute.xlu0 %1085 }
  0xae   : > { %v1090_v63 = vpop.permute.xlu0 %1089 }
  0xb0   : > { %1776 = vmatmul.mubr.msk.bf16.vlgmr.msra.gmra.mxu1 %vm275_vm4, %v871_v57 }
  0xb1   : > { %1786 = vmatmul.mubr.msk.bf16.vlgmr.msra.gmra.mxu0 %vm275_vm4, %v2054_v45  ;;  %1794 = vmatpush3.bf16.msra.mxu1 %v1106_v58  ;;  %v1088_v45 = vpop.permute.xlu1 %1087 }
  0xb2   : > { %1804 = vmatpush3.bf16.msra.mxu0 %v1336_v59  ;;  %1789 = vmatprep.mubr.msk.bf16.mxu0 %vm275_vm4, %v2059_v46 }
  0xb3   : > { %1779 = vmatprep.mubr.msk.bf16.mxu1 %vm275_vm4, %v873_v60 }
  0xb5   : > { %v1092_v46 = vpop.permute.xlu1 %1091 }
  0xb8   : > { %1780 = vmatmul.mubr.msk.bf16.gmra.mxu1 %vm275_vm4, %v875_v61 }
  0xb9   : > { %1790 = vmatmul.mubr.msk.bf16.gmra.mxu0 %vm275_vm4, %v2064_v47  ;;  %1795 = vmatprep.mubr.msk.bf16.mxu1 %vm275_vm4, %v1086_v44 }
  0xba   : > { %1805 = vmatprep.mubr.msk.bf16.mxu0 %vm275_vm4, %v2082_v30 }
  0xc0   : > { %1796 = vmatmul.mubr.msk.bf16.vlgmr.msra.gmra.mxu1 %vm275_vm4, %v1088_v45 }
  0xc1   : > { %1806 = vmatmul.mubr.msk.bf16.vlgmr.msra.gmra.mxu0 %vm275_vm4, %v2094_v62  ;;  %1799 = vmatprep.mubr.msk.bf16.mxu1 %vm275_vm4, %v1090_v63 }
  0xc2   : > { %1809 = vmatprep.mubr.msk.bf16.mxu0 %vm275_vm4, %v2102_v26 }
  0xc8   : > { %1800 = vmatmul.mubr.msk.bf16.gmra.mxu1 %vm275_vm4, %v1092_v46 }
  0xc9   : > { %1810 = vmatmul.mubr.msk.bf16.gmra.mxu0 %vm275_vm4, %v2108_v35 }
 0x148   : > { %v2196_v47 = vpop.f32.mrf.mxu1 }
 0x149   : > { %v1727_v30 = vpop.f32.mrf.mxu0 }
 0x14a   : > { %v342_v0 = vpop.f32.mrf.mxu1 }
 0x14b   : > { %v326_v1 = vpop.f32.mrf.mxu0 }
 0x14c   : > { %v2198_v8 = vpop.f32.mrf.mxu1 }
 0x14d   : > { %v1728_v9 = vpop.f32.mrf.mxu0 }
 0x14e   : > { %v2200_v62 = vpop.f32.mrf.mxu1 }
 0x14f   : > { %v329_v10 = vpop.f32.mrf.mxu0 }
 0x150   : > { %v1737_v11 = vpop.f32.mrf.mxu1 }
 0x151   : > { %v1747_v12 = vpop.f32.mrf.mxu0  ;;  %v415_v32 = vadd.f32 %v1737_v11, %v1727_v30 }
 0x152   : > { %v406_v13 = vpop.f32.mrf.mxu1 }
 0x153   : > { %v631_v14 = vpop.f32.mrf.mxu0  ;;  %v407_v51 = vadd.f32 %v406_v13, %v326_v1  ;;  %v664_v56 = vadd.f32 %v1747_v12, %v415_v32 }
 0x154   : > { %v1738_v15 = vpop.f32.mrf.mxu1 }
 0x155   : > { %v1748_v16 = vpop.f32.mrf.mxu0  ;;  %v662_v38 = vadd.f32 %v631_v14, %v407_v51  ;;  %v418_v57 = vadd.f32 %v1738_v15, %v1728_v9 }
 0x156   : > { %v409_v17 = vpop.f32.mrf.mxu1 }
 0x157   : > { %v634_v18 = vpop.f32.mrf.mxu0  ;;  %v410_v52 = vadd.f32 %v409_v17, %v329_v10  ;;  %v665_v1 = vadd.f32 %v1748_v16, %v418_v57 }
 0x158   : > { %v2202_v19 = vpop.f32.mrf.mxu1 }
 0x159   : > { %v2204_v20 = vpop.f32.mrf.mxu0  ;;  %v663_v58 = vadd.f32 %v634_v18, %v410_v52 }
 0x15a   : > { %v422_v21 = vpop.f32.mrf.mxu1 }
 0x15b   : > { %v647_v22 = vpop.f32.mrf.mxu0  ;;  %v423_v46 = vadd.f32 %v422_v21, %v342_v0 }
 0x15c   : > { %v2206_v23 = vpop.f32.mrf.mxu1 }
 0x15d   : > { %v2208_v24 = vpop.f32.mrf.mxu0  ;;  %v666_v15 = vadd.f32 %v647_v22, %v423_v46 }
 0x15e   : > { %v425_v25 = vpop.f32.mrf.mxu1 }
 0x15f   : > { %v2210_v26 = vpop.f32.mrf.mxu0  ;;  %v426_v18 = vadd.f32 %v425_v25, %v2200_v62 }
 0x160   : > { %v1757_v27 = vpop.f32.mrf.mxu1 }
 0x161   : > { %v1767_v29 = vpop.f32.mrf.mxu0  ;;  %v762_v61 = vadd.f32 %v1757_v27, %v664_v56 }
 0x162   : > { %v729_v31 = vpop.f32.mrf.mxu1 }
 0x163   : > { %v827_v33 = vpop.f32.mrf.mxu0  ;;  %v760_v6 = vadd.f32 %v729_v31, %v662_v38  ;;  %v860_v14 = vadd.f32 %v1767_v29, %v762_v61  ;;  %v431_v38 = vadd.f32 %v2202_v19, %v2196_v47  ;;  %v667_v29 = vadd.f32 %v2210_v26, %v426_v18 }
 0x164   : > { %v1758_v34 = vpop.f32.mrf.mxu1  ;;  %v434_v26 = vadd.f32 %v2206_v23, %v2198_v8 }
 0x165   : > { %v1768_v35 = vpop.f32.mrf.mxu0  ;;  %v858_v44 = vadd.f32 %v827_v33, %v760_v6  ;;  %v763_v17 = vadd.f32 %v1758_v34, %v665_v1  ;;  %v668_v47 = vadd.f32 %v2204_v20, %v431_v38 }
 0x166   : > { %v732_v36 = vpop.f32.mrf.mxu1  ;;  %v669_v20 = vadd.f32 %v2208_v24, %v434_v26 }
 0x167   : > { %v830_v37 = vpop.f32.mrf.mxu0  ;;  %v761_v45 = vadd.f32 %v732_v36, %v663_v58  ;;  %v861_v32 = vadd.f32 %v1768_v35, %v763_v17 }
 0x168   : > { %v2212_v39 = vpop.f32.mrf.mxu1 }
 0x169   : > { %v2214_v40 = vpop.f32.mrf.mxu0  ;;  %v859_v12 = vadd.f32 %v830_v37, %v761_v45  ;;  %v766_v58 = vadd.f32 %v2212_v39, %v668_v47 }
 0x16a   : > { %v745_v41 = vpop.f32.mrf.mxu1 }
 0x16b   : > { %v843_v48 = vpop.f32.mrf.mxu0  ;;  %v764_v0 = vadd.f32 %v745_v41, %v666_v15  ;;  %v1675_v41 = vld [vmem:[%s2268_s2] ss:$0 sm:$0xff]  ;;  %v864_v8 = vadd.f32 %v2214_v40, %v766_v58 }
 0x16c   : > { %v2216_v43 = vpop.f32.mrf.mxu1 }
 0x16d   : > { %v2218_v49 = vpop.f32.mrf.mxu0  ;;  %v767_v23 = vadd.f32 %v2216_v43, %v669_v20 }
 0x16e   : > { %v748_v2 = vpop.f32.mrf.mxu1 }
 0x16f   : > { %v2220_v3 = vpop.f32.mrf.mxu0  ;;  %v765_v35 = vadd.f32 %v748_v2, %v667_v29 }
 0x170   : > { %v1777_v50 = vpop.f32.mrf.mxu1 }
 0x171   : > { %v1787_v5 = vpop.f32.mrf.mxu0  ;;  %v958_v27 = vadd.f32 %v1777_v50, %v860_v14  ;;  %v862_v50 = vadd.f32 %v843_v48, %v764_v0  ;;  %v863_v2 = vadd.f32 %v2220_v3, %v765_v35 }
 0x172   : > { %v925_v7 = vpop.f32.mrf.mxu1 }
 0x173   : > { %v1044_v28 = vpop.f32.mrf.mxu0  ;;  %v956_v10 = vadd.f32 %v925_v7, %v858_v44  ;;  %v1077_v37 = vadd.f32 %v1787_v5, %v958_v27 }
 0x174   : > { %v1778_v4 = vpop.f32.mrf.mxu1 }
 0x175   : > { %v1788_v53 = vpop.f32.mrf.mxu0  ;;  %v1075_v33 = vadd.f32 %v1044_v28, %v956_v10  ;;  %v959_v22 = vadd.f32 %v1778_v4, %v861_v32 }
 0x176   : > { %v928_v54 = vpop.f32.mrf.mxu1 }
 0x177   : > { %v1047_v42 = vpop.f32.mrf.mxu0  ;;  %v957_v36 = vadd.f32 %v928_v54, %v859_v12  ;;  %v1078_v5 = vadd.f32 %v1788_v53, %v959_v22 }
 0x178   : > { %v2222_v55 = vpop.f32.mrf.mxu1 }
 0x179   : > { %v2224_v59 = vpop.f32.mrf.mxu0  ;;  %v1076_v52 = vadd.f32 %v1047_v42, %v957_v36  ;;  %v962_v3 = vadd.f32 %v2222_v55, %v864_v8 }
 0x17a   : > { %v941_v60 = vpop.f32.mrf.mxu1 }
 0x17b   : > { %v1060_v63 = vpop.f32.mrf.mxu0  ;;  %v960_v4 = vadd.f32 %v941_v60, %v862_v50 }
 0x17c   : > { %v2226_v30 = vpop.f32.mrf.mxu1 }
 0x17d   : > { %v2228_v11 = vpop.f32.mrf.mxu0  ;;  %v1079_v14 = vadd.f32 %v1060_v63, %v960_v4 }
 0x17e   : > { %v944_v13 = vpop.f32.mrf.mxu1 }
 0x17f   : > { %v1063_v9 = vpop.f32.mrf.mxu0  ;;  %v961_v17 = vadd.f32 %v944_v13, %v863_v2 }
 0x180   : > { %v1797_v31 = vpop.f32.mrf.mxu1 }
 0x181   : > { %v1807_v51 = vpop.f32.mrf.mxu0  ;;  %v1175_v54 = vadd.f32 %v1797_v31, %v1077_v37  ;;  %v1080_v18 = vadd.f32 %v1063_v9, %v961_v17  ;;  %v865_v31 = vadd.f32 %v2218_v49, %v767_v23 }
 0x182   : > { %v1142_v21 = vpop.f32.mrf.mxu1 }
 0x183   : > { %v1173_v16 = vadd.f32 %v1142_v21, %v1075_v33  ;;  %v1372_v7 = vpop.f32.mrf.mxu0  ;;  %v1405_v44 = vadd.f32 %v1807_v51, %v1175_v54  ;;  %v1081_v33 = vadd.f32 %v2224_v59, %v962_v3  ;;  %v963_v40 = vadd.f32 %v2226_v30, %v865_v31 }
 0x184   : > { %v1798_v34 = vpop.f32.mrf.mxu1 }
 0x185   : > { %v1403_v62 = vadd.f32 %v1372_v7, %v1173_v16  ;;  %v1808_v25 = vpop.f32.mrf.mxu0  ;;  %v1176_v45 = vadd.f32 %v1798_v34, %v1078_v5  ;;  %v1420_v53 = vadd.f32 %v1675_v41, %v1405_v44  ;;  %v1082_v0 = vadd.f32 %v2228_v11, %v963_v40 }
 0x186   : > { %v1145_v28 = vpop.f32.mrf.mxu1 }
 0x187   : > { %v1174_v6 = vadd.f32 %v1145_v28, %v1076_v52  ;;  %v1375_v56 = vpop.f32.mrf.mxu0  ;;  %v1418_v57 = vadd.f32 %v1675_v41, %v1403_v62  ;;  %v1406_v60 = vadd.f32 %v1808_v25, %v1176_v45 }
 0x188   : > { %v1801_v19 = vpop.f32.mrf.mxu1 }
 0x189   : > { %v1404_v42 = vadd.f32 %v1375_v56, %v1174_v6  ;;  %1426 = vxpose.xlu0.b32.start [1/8] (short) (narrow) %v1418_v57, 8  ;;  %v1811_v48 = vpop.f32.mrf.mxu0  ;;  %v1421_v27 = vadd.f32 %v1675_v41, %v1406_v60  ;;  %v1179_v43 = vadd.f32 %v1801_v19, %v1081_v33 }
 0x18a   : > { %v1158_v61 = vpop.f32.mrf.mxu1 }
 0x18b   : > { %v1419_v46 = vadd.f32 %v1675_v41, %v1404_v42  ;;  %v1388_v10 = vpop.f32.mrf.mxu0  ;;  %v1177_v39 = vadd.f32 %v1158_v61, %v1079_v14  ;;  %v1409_v55 = vadd.f32 %v1811_v48, %v1179_v43 }
 0x18c   : > { %v1802_v1 = vpop.f32.mrf.mxu1 }
 0x18d   : > { %1427 = vxpose.xlu0.b32.cont [2/8] (short) (narrow) %v1419_v46, 8  ;;  %v1812_v15 = vpop.f32.mrf.mxu0  ;;  %v1407_v24 = vadd.f32 %v1388_v10, %v1177_v39  ;;  %v1180_v9 = vadd.f32 %v1802_v1, %v1082_v0  ;;  %v1424_v49 = vadd.f32 %v1675_v41, %v1409_v55 }
 0x18e   : > { %v1161_v12 = vpop.f32.mrf.mxu1 }
 0x18f   : > { %v1178_v63 = vadd.f32 %v1161_v12, %v1080_v18  ;;  %v1391_v13 = vpop.f32.mrf.mxu0  ;;  %v1422_v36 = vadd.f32 %v1675_v41, %v1407_v24  ;;  %v1410_v32 = vadd.f32 %v1812_v15, %v1180_v9 }
 0x191   : > { %1428 = vxpose.xlu0.b32.cont [3/8] (short) (narrow) %v1420_v53, 8  ;;  %v1408_v51 = vadd.f32 %v1391_v13, %v1178_v63  ;;  %v1425_v16 = vadd.f32 %v1675_v41, %v1410_v32 }
 0x193   : > { %v1423_v21 = vadd.f32 %v1675_v41, %v1408_v51 }
 0x195   : > { %1429 = vxpose.xlu0.b32.cont [4/8] (short) (narrow) %v1421_v27, 8 }
 0x199   : > { %1430 = vxpose.xlu0.b32.cont [5/8] (short) (narrow) %v1422_v36, 8 }
 0x19d   : > { %1431 = vxpose.xlu0.b32.cont [6/8] (short) (narrow) %v1423_v21, 8 }
 0x1a1   : > { %1432 = vxpose.xlu0.b32.cont [7/8] (short) (narrow) %v1424_v49, 8 }
 0x1a5   : > { %1433 = vxpose.xlu0.b32.end [8/8] (short) (narrow) %v1425_v16, 8 }
 0x205   : > { %v1442_v59 = vpop.trf.xlu0 }
 0x206   : > { %1459 = vst.msk [vmem:[%s227_s27] sm:$0xff] %vm1458_vm5, %v1442_v59  ;;  %v1463_v30 = vmul.f32 %v1442_v59, %v1442_v59  ;;  %v1460_v11 = vsel %vm1458_vm5, %v1442_v59, 0.0 }
 0x207   : > { %1461 = vadd.xlane.f32.xlu1 %v1460_v11 }
 0x208   : > { %v1464_v7 = vsel %vm1458_vm5, %v1463_v30, 0.0 }
 0x20b   : > { %1465 = vadd.xlane.f32.xlu1 %v1464_v7 }
 0x290   : > { %v1462_v38 = vpop.xlane.xlu1 %1461 }
 0x294   : > { %v1466_v29 = vpop.xlane.xlu1 %1465 }
 0x295   : > { %v1468_v34 = vsel %vm1467_vm6, %v1462_v38, %v1466_v29 }
 0x296   : > { %1470 = vst.msk [vmem:[%s234_s30] sm:$0xff] %vm1469_vm7, %v1468_v34 }
 0x297 PF: > { %s15_s17 = sadd.s32 1, %s1884_s17   ;;  %s2273_s15 = smov %s1880_s16 }
 0x298   : > { %p12_p5 = scmp.ge.s32.totalorder %s15_s17, 4   ;;  %s2274_s16 = smov %s2276_s18 }
 0x29a   :  { %14 = sbr.rel (!%p12_p5) target bundleno = 2 (0x2), region = 83 }

</bundles_post_ra>
